<compile_context>
chip_gen: v7x
topology: tpu7x:2x2x1
jax: 0.10.0
libtpu: 0.0.40
codegen_flags: <defaults>
</compile_context>

<pallas_src>
import functools
import math

import jax
import jax.numpy as jnp
from jax.experimental import pallas as pl
from jax.experimental.pallas import tpu as pltpu


def _round_up(n, m):
    return ((n + m - 1) // m) * m


def _cdiv(a, b):
    return -(-a // b)


def _disc_kernel(x_ref,
                 w1_ref, b1_ref,
                 w2_ref, b2_ref,
                 w3_ref, b3_ref,
                 w4_ref, b4_ref,
                 o_ref,
                 *, chunk, n_chunks):
    # Resident weights (constant index_map -> loaded once, reused every step).
    w1 = w1_ref[...]            # (256, 2)  f32
    w1c0 = w1[:, 0:1]           # (256, 1)
    w1c1 = w1[:, 1:2]           # (256, 1)
    b1 = b1_ref[...]            # (256, 1)  f32
    w2 = w2_ref[...]            # (128, 256) bf16
    b2 = b2_ref[...]            # (128, 1)  f32
    w3 = w3_ref[...]            # (64, 128) bf16
    b3 = b3_ref[...]            # (64, 1)   f32
    w4 = w4_ref[...]            # (64, 1)   f32
    b4 = b4_ref[...]            # (1, 1)    f32

    # Static unroll over lane chunks: independent chunks let the scheduler
    # overlap VPU (layer 1), MXU (layers 2/3) and XLU/EUP (layer 4 + sigmoid).
    for c in range(n_chunks):
        lo = c * chunk
        xc = x_ref[:, pl.ds(lo, chunk)]                  # (2, chunk) f32

        # ---- Layer 1: Linear(2, 256) + ReLU.  K=2 -> VPU broadcast FMAs. ----
        h = w1c0 * xc[0:1, :] + w1c1 * xc[1:2, :] + b1   # (256, chunk) f32
        h = jnp.maximum(h, 0.0).astype(jnp.bfloat16)
        # Dropout(0.3) -> identity in eval mode.

        # ---- Layer 2: Linear(256, 128) + ReLU.  MXU, feature-major. ----
        h = jnp.dot(w2, h, preferred_element_type=jnp.float32) + b2  # (128, chunk)
        h = jnp.maximum(h, 0.0).astype(jnp.bfloat16)

        # ---- Layer 3: Linear(128, 64) + ReLU.  MXU, feature-major. ----
        h = jnp.dot(w3, h, preferred_element_type=jnp.float32) + b3  # (64, chunk)
        h = jnp.maximum(h, 0.0)                                      # keep f32

        # ---- Layer 4: Linear(64, 1) + Sigmoid.  N=1 -> VPU mul + sublane reduce.
        logits = jnp.sum(h * w4, axis=0, keepdims=True) + b4         # (1, chunk)
        o_ref[:, pl.ds(lo, chunk)] = jax.nn.sigmoid(logits).astype(o_ref.dtype)


def prepare_params(params):
    """One-time prep: transpose to feature-major layout, pre-cast MXU weights to bf16."""
    return dict(
        w1T=jnp.asarray(params["w1"].T, jnp.float32),               # (256, 2)
        b1T=jnp.asarray(params["b1"].reshape(-1, 1), jnp.float32),  # (256, 1)
        w2T=jnp.asarray(params["w2"].T, jnp.bfloat16),              # (128, 256)
        b2T=jnp.asarray(params["b2"].reshape(-1, 1), jnp.float32),  # (128, 1)
        w3T=jnp.asarray(params["w3"].T, jnp.bfloat16),              # (64, 128)
        b3T=jnp.asarray(params["b3"].reshape(-1, 1), jnp.float32),  # (64, 1)
        w4c=jnp.asarray(params["w4"].reshape(-1, 1), jnp.float32),  # (64, 1)
        b4=jnp.asarray(params["b4"].reshape(1, 1), jnp.float32),    # (1, 1)
    )


def discriminator_forward(x, prepped, *, block_b=2048):
    """x: (B, 2) float32.  prepped: dict from prepare_params()."""
    B = x.shape[0]

    # Adaptive batch tile (lane axis -> multiple of 128):
    #   * >= 2 grid steps whenever B allows it, so the "parallel" axis shards
    #     across both v7x TensorCores;
    #   * tile derived from B (not just block_b) to bound padding waste.
    min_steps = 2 if B > 128 else 1
    n_steps = max(min_steps, _cdiv(B, block_b))
    tb = _round_up(_cdiv(B, n_steps), 128)
    b_pad = n_steps * tb

    # In-kernel lane sub-chunking (static unroll inside the kernel body).
    if tb % 512 == 0:
        chunk = 512
    elif tb % 256 == 0:
        chunk = 256
    else:
        chunk = tb
    n_chunks = tb // chunk

    xT = x.T                                            # (2, B): batch on lanes
    if b_pad != B:
        xT = jnp.pad(xT, ((0, 0), (0, b_pad - B)))

    # Full-array blocks with a constant index_map -> resident across grid steps.
    def resident(arr):
        return pl.BlockSpec(arr.shape, lambda i: (0, 0))

    flops = 2 * b_pad * (2 * 256 + 256 * 128 + 128 * 64 + 64)
    bytes_accessed = (xT.size * 4 + b_pad * 4
                      + sum(int(v.size) * v.dtype.itemsize for v in prepped.values()))

    out = pl.pallas_call(
        functools.partial(_disc_kernel, chunk=chunk, n_chunks=n_chunks),
        out_shape=jax.ShapeDtypeStruct((1, b_pad), jnp.float32),
        grid=(n_steps,),
        in_specs=[
            pl.BlockSpec((2, tb), lambda i: (0, i)),
            resident(prepped["w1T"]), resident(prepped["b1T"]),
            resident(prepped["w2T"]), resident(prepped["b2T"]),
            resident(prepped["w3T"]), resident(prepped["b3T"]),
            resident(prepped["w4c"]), resident(prepped["b4"]),
        ],
        out_specs=pl.BlockSpec((1, tb), lambda i: (0, i)),   # lane-dense output
        compiler_params=pltpu.CompilerParams(
            dimension_semantics=("parallel",)),
        cost_estimate=pl.CostEstimate(
            flops=flops,
            transcendentals=b_pad,
            bytes_accessed=bytes_accessed),
    )(xT,
      prepped["w1T"], prepped["b1T"],
      prepped["w2T"], prepped["b2T"],
      prepped["w3T"], prepped["b3T"],
      prepped["w4c"], prepped["b4"])

    return out[:, :B].T                                  # (B, 1)


def _init_linear(key, fan_in, fan_out):
    """Deterministic init mimicking PyTorch nn.Linear default (Kaiming-uniform-ish)."""
    kw, kb = jax.random.split(key)
    bound = 1.0 / math.sqrt(fan_in)
    # stored as (in, out) so the reference does x @ W
    w = jax.random.uniform(kw, (fan_in, fan_out), jnp.float32, -bound, bound)
    b = jax.random.uniform(kb, (1, fan_out), jnp.float32, -bound, bound)
    return w, b


def make_params(key):
    k1, k2, k3, k4 = jax.random.split(key, 4)
    w1, b1 = _init_linear(k1, 2, 256)
    w2, b2 = _init_linear(k2, 256, 128)
    w3, b3 = _init_linear(k3, 128, 64)
    w4, b4 = _init_linear(k4, 64, 1)
    return dict(w1=w1, b1=b1, w2=w2, b2=b2, w3=w3, b3=b3, w4=w4, b4=b4)


def _reference_forward_f32(x, p):
    h = jnp.maximum(x @ p["w1"] + p["b1"], 0.0)
    h = jnp.maximum(h @ p["w2"] + p["b2"], 0.0)
    h = jnp.maximum(h @ p["w3"] + p["b3"], 0.0)
    return jax.nn.sigmoid(h @ p["w4"] + p["b4"])


def _reference_forward_mixed(x, p):
    """Mirrors the kernel's bf16 casts (MXU layers 2/3, bf16 intermediates)."""
    h = jnp.maximum(x @ p["w1"] + p["b1"], 0.0).astype(jnp.bfloat16)
    h = jnp.dot(h, p["w2"].astype(jnp.bfloat16),
                preferred_element_type=jnp.float32) + p["b2"]
    h = jnp.maximum(h, 0.0).astype(jnp.bfloat16)
    h = jnp.dot(h, p["w3"].astype(jnp.bfloat16),
                preferred_element_type=jnp.float32) + p["b3"]
    h = jnp.maximum(h, 0.0)
    return jax.nn.sigmoid(h @ p["w4"] + p["b4"])


if __name__ == "__main__":
    key = jax.random.PRNGKey(0)
    k_params, k_x = jax.random.split(key)

    raw_params = make_params(k_params)
    prepped = prepare_params(raw_params)

    # Small batch (single grid step, single chunk, padded to one 128-lane tile).
    B = 8
    x = jax.random.normal(k_x, (B, 2), jnp.float32)
    out = jax.block_until_ready(discriminator_forward(x, prepped))
    assert out.shape == (B, 1)
    assert jnp.allclose(out, _reference_forward_mixed(x, raw_params), atol=2e-3, rtol=0), \
        "mismatch vs bf16-matched reference"
    assert jnp.allclose(out, _reference_forward_f32(x, raw_params), atol=3e-2, rtol=0), \
        "mismatch vs f32 reference"

    # Larger batch: exercises >=2 grid steps and the multi-chunk unroll + padding.
    B2 = 1500
    x2 = jax.random.normal(jax.random.PRNGKey(1), (B2, 2), jnp.float32)
    out2 = jax.block_until_ready(discriminator_forward(x2, prepped))
    assert out2.shape == (B2, 1)
    assert jnp.allclose(out2, _reference_forward_mixed(x2, raw_params), atol=2e-3, rtol=0), \
        "mismatch vs reference (multi-step / padded batch)"

    print("KERNEL_OK")
</pallas_src>

<mosaic_0001>
module attributes {stable_mosaic.version = 11 : i64} {
  func.func @_disc_kernel(%arg0: i32, %arg1: memref<2x128xf32, #tpu.memory_space<vmem>>, %arg2: memref<256x2xf32, #tpu.memory_space<vmem>>, %arg3: memref<256x1xf32, #tpu.memory_space<vmem>>, %arg4: memref<128x256xbf16, #tpu.memory_space<vmem>>, %arg5: memref<128x1xf32, #tpu.memory_space<vmem>>, %arg6: memref<64x128xbf16, #tpu.memory_space<vmem>>, %arg7: memref<64x1xf32, #tpu.memory_space<vmem>>, %arg8: memref<64x1xf32, #tpu.memory_space<vmem>>, %arg9: memref<1x1xf32, #tpu.memory_space<vmem>>, %arg10: memref<1x128xf32, #tpu.memory_space<vmem>>) attributes {dimension_semantics = [#tpu.dimension_semantics<parallel>], iteration_bounds = array<i64: 1>, scalar_prefetch = 0 : i64, scratch_operands = 0 : i64, tpu.core_type = #tpu.core_type<tc>, window_params = [{transform_indices = @transform_0, window_bounds = array<i64: 2, 128>}, {pipeline_mode = #tpu.pipeline_mode<synchronous>, transform_indices = @transform_1, window_bounds = array<i64: 256, 2>}, {pipeline_mode = #tpu.pipeline_mode<synchronous>, transform_indices = @transform_2, window_bounds = array<i64: 256, 1>}, {pipeline_mode = #tpu.pipeline_mode<synchronous>, transform_indices = @transform_3, window_bounds = array<i64: 128, 256>}, {pipeline_mode = #tpu.pipeline_mode<synchronous>, transform_indices = @transform_4, window_bounds = array<i64: 128, 1>}, {pipeline_mode = #tpu.pipeline_mode<synchronous>, transform_indices = @transform_5, window_bounds = array<i64: 64, 128>}, {pipeline_mode = #tpu.pipeline_mode<synchronous>, transform_indices = @transform_6, window_bounds = array<i64: 64, 1>}, {pipeline_mode = #tpu.pipeline_mode<synchronous>, transform_indices = @transform_7, window_bounds = array<i64: 64, 1>}, {pipeline_mode = #tpu.pipeline_mode<synchronous>, transform_indices = @transform_8, window_bounds = array<i64: 1, 1>}, {transform_indices = @transform_9, window_bounds = array<i64: 1, 128>}]} {
    %c0 = arith.constant 0 : index
    %c0_0 = arith.constant 0 : index
    %0 = vector.load %arg2[%c0, %c0_0] : memref<256x2xf32, #tpu.memory_space<vmem>>, vector<256x2xf32>
    %1 = vector.extract_strided_slice %0 {offsets = [0, 0], sizes = [256, 1], strides = [1, 1]} : vector<256x2xf32> to vector<256x1xf32>
    %2 = vector.extract_strided_slice %0 {offsets = [0, 1], sizes = [256, 1], strides = [1, 1]} : vector<256x2xf32> to vector<256x1xf32>
    %c0_1 = arith.constant 0 : index
    %c0_2 = arith.constant 0 : index
    %3 = vector.load %arg3[%c0_1, %c0_2] : memref<256x1xf32, #tpu.memory_space<vmem>>, vector<256x1xf32>
    %c0_3 = arith.constant 0 : index
    %c0_4 = arith.constant 0 : index
    %4 = vector.load %arg4[%c0_3, %c0_4] : memref<128x256xbf16, #tpu.memory_space<vmem>>, vector<128x256xbf16>
    %c0_5 = arith.constant 0 : index
    %c0_6 = arith.constant 0 : index
    %5 = vector.load %arg5[%c0_5, %c0_6] : memref<128x1xf32, #tpu.memory_space<vmem>>, vector<128x1xf32>
    %c0_7 = arith.constant 0 : index
    %c0_8 = arith.constant 0 : index
    %6 = vector.load %arg6[%c0_7, %c0_8] : memref<64x128xbf16, #tpu.memory_space<vmem>>, vector<64x128xbf16>
    %c0_9 = arith.constant 0 : index
    %c0_10 = arith.constant 0 : index
    %7 = vector.load %arg7[%c0_9, %c0_10] : memref<64x1xf32, #tpu.memory_space<vmem>>, vector<64x1xf32>
    %c0_11 = arith.constant 0 : index
    %c0_12 = arith.constant 0 : index
    %8 = vector.load %arg8[%c0_11, %c0_12] : memref<64x1xf32, #tpu.memory_space<vmem>>, vector<64x1xf32>
    %c0_13 = arith.constant 0 : index
    %c0_14 = arith.constant 0 : index
    %9 = vector.load %arg9[%c0_13, %c0_14] : memref<1x1xf32, #tpu.memory_space<vmem>>, vector<1x1xf32>
    %c0_15 = arith.constant 0 : index
    %c0_16 = arith.constant 0 : index
    %10 = vector.load %arg1[%c0_15, %c0_16] : memref<2x128xf32, #tpu.memory_space<vmem>>, vector<2x128xf32>
    %11 = vector.extract_strided_slice %10 {offsets = [0, 0], sizes = [1, 128], strides = [1, 1]} : vector<2x128xf32> to vector<1x128xf32>
    %12 = vector.broadcast %1 : vector<256x1xf32> to vector<256x128xf32>
    %13 = vector.broadcast %11 : vector<1x128xf32> to vector<256x128xf32>
    %14 = arith.mulf %12, %13 : vector<256x128xf32>
    %15 = vector.extract_strided_slice %10 {offsets = [1, 0], sizes = [1, 128], strides = [1, 1]} : vector<2x128xf32> to vector<1x128xf32>
    %16 = vector.broadcast %2 : vector<256x1xf32> to vector<256x128xf32>
    %17 = vector.broadcast %15 : vector<1x128xf32> to vector<256x128xf32>
    %18 = arith.mulf %16, %17 : vector<256x128xf32>
    %19 = arith.addf %14, %18 : vector<256x128xf32>
    %20 = vector.broadcast %3 : vector<256x1xf32> to vector<256x128xf32>
    %21 = arith.addf %19, %20 : vector<256x128xf32>
    %cst = arith.constant 0.000000e+00 : f32
    %22 = vector.broadcast %cst : f32 to vector<256x128xf32>
    %23 = arith.maximumf %21, %22 : vector<256x128xf32>
    %24 = arith.truncf %23 : vector<256x128xf32> to vector<256x128xbf16>
    %cst_17 = arith.constant dense<0.000000e+00> : vector<128x128xf32>
    %25 = tpu.matmul %4, %24, %cst_17 {dimension_numbers = #tpu.dot_dimension_numbers<[1], [0], [0], [1], [0, 0, 1, 1], [], []>} : vector<128x256xbf16>, vector<256x128xbf16>, vector<128x128xf32> -> vector<128x128xf32>
    %26 = vector.broadcast %5 : vector<128x1xf32> to vector<128x128xf32>
    %27 = arith.addf %25, %26 : vector<128x128xf32>
    %cst_18 = arith.constant 0.000000e+00 : f32
    %28 = vector.broadcast %cst_18 : f32 to vector<128x128xf32>
    %29 = arith.maximumf %27, %28 : vector<128x128xf32>
    %30 = arith.truncf %29 : vector<128x128xf32> to vector<128x128xbf16>
    %cst_19 = arith.constant dense<0.000000e+00> : vector<64x128xf32>
    %31 = tpu.matmul %6, %30, %cst_19 {dimension_numbers = #tpu.dot_dimension_numbers<[1], [0], [0], [1], [0, 0, 1, 1], [], []>} : vector<64x128xbf16>, vector<128x128xbf16>, vector<64x128xf32> -> vector<64x128xf32>
    %32 = vector.broadcast %7 : vector<64x1xf32> to vector<64x128xf32>
    %33 = arith.addf %31, %32 : vector<64x128xf32>
    %cst_20 = arith.constant 0.000000e+00 : f32
    %34 = vector.broadcast %cst_20 : f32 to vector<64x128xf32>
    %35 = arith.maximumf %33, %34 : vector<64x128xf32>
    %36 = vector.broadcast %8 : vector<64x1xf32> to vector<64x128xf32>
    %37 = arith.mulf %35, %36 : vector<64x128xf32>
    %cst_21 = arith.constant dense<0.000000e+00> : vector<128xf32>
    %38 = vector.multi_reduction <add>, %37, %cst_21 [0] : vector<64x128xf32> to vector<128xf32>
    %39 = vector.shape_cast %38 : vector<128xf32> to vector<1x128xf32>
    %40 = vector.broadcast %9 : vector<1x1xf32> to vector<1x128xf32>
    %41 = arith.addf %39, %40 : vector<1x128xf32>
    %42 = arith.negf %41 : vector<1x128xf32>
    %43 = math.exp %42 : vector<1x128xf32>
    %cst_22 = arith.constant 1.000000e+00 : f32
    %44 = vector.broadcast %cst_22 : f32 to vector<1x128xf32>
    %45 = arith.addf %44, %43 : vector<1x128xf32>
    %46 = arith.divf %44, %45 : vector<1x128xf32>
    %c0_23 = arith.constant 0 : index
    %c0_24 = arith.constant 0 : index
    %47 = vector.load %arg10[%c0_23, %c0_24] : memref<1x128xf32, #tpu.memory_space<vmem>>, vector<1x128xf32>
    tpu.vector_store %arg10[%c0_23, %c0_24], %46 {strides = array<i32>} : memref<1x128xf32, #tpu.memory_space<vmem>>, vector<1x128xf32>,
    return
  }
  func.func @transform_0(%arg0: i32) -> (i32, i32) {
    %c0_i32 = arith.constant 0 : i32
    %c0_i32_0 = arith.constant 0 : i32
    return %c0_i32, %arg0 : i32, i32
  }
  func.func @transform_1(%arg0: i32) -> (i32, i32) {
    %c0_i32 = arith.constant 0 : i32
    %c0_i32_0 = arith.constant 0 : i32
    %c0_i32_1 = arith.constant 0 : i32
    return %c0_i32, %c0_i32_0 : i32, i32
  }
  func.func @transform_2(%arg0: i32) -> (i32, i32) {
    %c0_i32 = arith.constant 0 : i32
    %c0_i32_0 = arith.constant 0 : i32
    %c0_i32_1 = arith.constant 0 : i32
    return %c0_i32, %c0_i32_0 : i32, i32
  }
  func.func @transform_3(%arg0: i32) -> (i32, i32) {
    %c0_i32 = arith.constant 0 : i32
    %c0_i32_0 = arith.constant 0 : i32
    %c0_i32_1 = arith.constant 0 : i32
    return %c0_i32, %c0_i32_0 : i32, i32
  }
  func.func @transform_4(%arg0: i32) -> (i32, i32) {
    %c0_i32 = arith.constant 0 : i32
    %c0_i32_0 = arith.constant 0 : i32
    %c0_i32_1 = arith.constant 0 : i32
    return %c0_i32, %c0_i32_0 : i32, i32
  }
  func.func @transform_5(%arg0: i32) -> (i32, i32) {
    %c0_i32 = arith.constant 0 : i32
    %c0_i32_0 = arith.constant 0 : i32
    %c0_i32_1 = arith.constant 0 : i32
    return %c0_i32, %c0_i32_0 : i32, i32
  }
  func.func @transform_6(%arg0: i32) -> (i32, i32) {
    %c0_i32 = arith.constant 0 : i32
    %c0_i32_0 = arith.constant 0 : i32
    %c0_i32_1 = arith.constant 0 : i32
    return %c0_i32, %c0_i32_0 : i32, i32
  }
  func.func @transform_7(%arg0: i32) -> (i32, i32) {
    %c0_i32 = arith.constant 0 : i32
    %c0_i32_0 = arith.constant 0 : i32
    %c0_i32_1 = arith.constant 0 : i32
    return %c0_i32, %c0_i32_0 : i32, i32
  }
  func.func @transform_8(%arg0: i32) -> (i32, i32) {
    %c0_i32 = arith.constant 0 : i32
    %c0_i32_0 = arith.constant 0 : i32
    %c0_i32_1 = arith.constant 0 : i32
    return %c0_i32, %c0_i32_0 : i32, i32
  }
  func.func @transform_9(%arg0: i32) -> (i32, i32) {
    %c0_i32 = arith.constant 0 : i32
    %c0_i32_0 = arith.constant 0 : i32
    return %c0_i32, %arg0 : i32, i32
  }
}

</mosaic_0001>

<bundles_post_ra>
// kernel: tpu_custom_call.1
= control target key start
LH: loop header
LB: loop body
LE: loop exit
PB: predicated region body
PF: predicated region fallthrough
CT: control target
= control target key end

     0   :  { %s2196_s0 = inlined_call_operand.vmem [shape: f32[2,128], index: 0, kind: input, shape index: {}]   ;;  %s2197_s1 = inlined_call_operand.vmem [shape: f32[256,2], index: 1, kind: input, shape index: {}]   ;;  %s2198_s2 = inlined_call_operand.vmem [shape: f32[256,1], index: 2, kind: input, shape index: {}]   ;;  %s2199_s3 = inlined_call_operand.vmem [shape: bf16[128,256], index: 3, kind: input, shape index: {}]   ;;  %s2200_s4 = inlined_call_operand.vmem [shape: f32[128,1], index: 4, kind: input, shape index: {}]   ;;  %s2201_s5 = inlined_call_operand.vmem [shape: bf16[64,128], index: 5, kind: input, shape index: {}]   ;;  %s2202_s6 = inlined_call_operand.vmem [shape: f32[64,1], index: 6, kind: input, shape index: {}]   ;;  %s2203_s7 = inlined_call_operand.vmem [shape: f32[64,1], index: 7, kind: input, shape index: {}]   ;;  %s2204_s8 = inlined_call_operand.<no memory space> [shape: f32[1,1], index: 8, kind: input, shape index: {}]   ;;  %s2205_s9 = inlined_call_operand.hbm [shape: f32[1,128], index: 9, kind: output, shape index: {}]  }
   0x1   :  { %v14_v0 = vstv %s2204_s8 }
   0x2   :  { %15 = vst [vmem:[#allocation2] sm:$0x1] %v14_v0 }
   0x3   :  { %v52_v1 = vld [vmem:[%s2197_s1 + $0x80] sm:$0xff]  ;;  %v1514_v3 = vmov 1   ;;  %v53_v4 = vld [vmem:[%s2197_s1 + $0x88] sm:$0xff]  ;;  %v1587_v5 = vld [vmem:[%s2197_s1 + $0x10] sm:$0xff]  ;;  %v1515_v8 = vmov 0  }
   0x4   :  { %v1576_v2 = vld [vmem:[%s2197_s1] sm:$0xff]  ;;  %1426 = vset.pattern.permute.xlu0 %v1514_v3  ;;  %1424 = vset.pattern.permute.xlu1 %v1514_v3  ;;  %v37_v7 = vld [vmem:[%s2197_s1 + $0x8] sm:$0xff]  ;;  %v1604_v10 = vld [vmem:[%s2197_s1 + $0xb0] sm:$0xff] }
   0x5   :  { %419 = vperm.xlu1 %1424, %v52_v1   ;;  %355 = vperm.xlu0 %1426, %v1576_v2   ;;  %v56_v6 = vld [vmem:[%s2197_s1 + $0xa0] sm:$0xff]  ;;  %v54_v11 = vld [vmem:[%s2197_s1 + $0x90] sm:$0xff] }
   0x6   :  { %v40_v9 = vld [vmem:[%s2197_s1 + $0x20] sm:$0xff]  ;;  %v1613_v12 = vld [vmem:[%s2197_s1 + $0x30] sm:$0xff] }
   0x7   :  { %v1620_v13 = vld [vmem:[%s2197_s1 + $0xc0] sm:$0xff] }
   0x9   :  { %423 = vperm.xlu1 %1424, %v53_v4   ;;  %363 = vperm.xlu0 %1426, %v1587_v5  }
   0xd   :  { %1425 = vset.pattern.permute.xlu1 %v1515_v8  ;;  %435 = vperm.xlu0 %1426, %v56_v6  }
   0xe   :  { %165 = vperm.xlu1 %1425, %v37_v7  }
  0x11   :  { %371 = vperm.xlu0 %1426, %v40_v9  }
  0x12   :  { %1427 = vset.pattern.permute.xlu1 %v1514_v3 }
  0x13   :  { %359 = vperm.xlu1 %1427, %v37_v7  }
  0x15   :  { %443 = vperm.xlu0 %1426, %v1604_v10  }
  0x17   :  { %1428 = vset.pattern.permute.xlu1 %v1515_v8 }
  0x18   :  { %250 = vperm.xlu1 %1428, %v54_v11  }
  0x19   :  { %379 = vperm.xlu0 %1426, %v1613_v12  }
  0x1c   :  { %1429 = vset.pattern.permute.xlu1 %v1514_v3 }
  0x1d   :  { %16 = vsyncpa [#allocation4], 0  ;;  %427 = vperm.xlu1 %1429, %v54_v11   ;;  %451 = vperm.xlu0 %1426, %v1620_v13   ;;  %v55_v14 = vld [vmem:[%s2197_s1 + $0x98] sm:$0xff]  ;;  %v1630_v15 = vld [vmem:[%s2197_s1 + $0x40] sm:$0xff] }
  0x1e   :  { %v1636_v16 = vld [vmem:[%s2197_s1 + $0xd0] sm:$0xff]  ;;  %v85_v17 = vld [vmem:[%s2198_s2 + $0x88] sm:$0xff]  ;;  %v39_v19 = vld [vmem:[%s2197_s1 + $0x18] sm:$0xff] }
  0x1f   :  { %v1646_v18 = vld [vmem:[%s2197_s1 + $0x50] sm:$0xff]  ;;  %v1655_v20 = vld [vmem:[%s2197_s1 + $0xe0] sm:$0xff]  ;;  %v57_v25 = vld [vmem:[%s2197_s1 + $0xa8] sm:$0xff] }
  0x20   :  { %v1662_v21 = vld [vmem:[%s2197_s1 + $0x60] sm:$0xff]  ;;  %v1671_v23 = vld [vmem:[%s2197_s1 + $0xf0] sm:$0xff]  ;;  %v41_v27 = vld [vmem:[%s2197_s1 + $0x28] sm:$0xff] }
  0x21   :  { %431 = vperm.xlu1 %1429, %v55_v14   ;;  %387 = vperm.xlu0 %1426, %v1630_v15   ;;  %v68_v22 = vld [vmem:[%s2198_s2] sm:$0xff]  ;;  %v1678_v24 = vld [vmem:[%s2197_s1 + $0x70] sm:$0xff]  ;;  %v69_v29 = vld [vmem:[%s2198_s2 + $0x8] sm:$0xff] }
  0x22   :  { %v86_v26 = vld [vmem:[%s2198_s2 + $0x90] sm:$0xff]  ;;  %v84_v28 = vld [vmem:[%s2198_s2 + $0x80] sm:$0xff]  ;;  %v87_v31 = vld [vmem:[%s2198_s2 + $0x98] sm:$0xff] }
  0x23   :  { %v70_v30 = vld [vmem:[%s2198_s2 + $0x10] sm:$0xff]  ;;  %v71_v32 = vld [vmem:[%s2198_s2 + $0x18] sm:$0xff]  ;;  %v89_v34 = vld [vmem:[%s2198_s2 + $0xa8] sm:$0xff] }
  0x24   :  { %v59_v33 = vld [vmem:[%s2197_s1 + $0xb8] sm:$0xff]  ;;  %v73_v35 = vld [vmem:[%s2198_s2 + $0x28] sm:$0xff]  ;;  %v88_v36 = vld [vmem:[%s2198_s2 + $0xa0] sm:$0xff] }
  0x25   :  { %1430 = vset.pattern.permute.xlu1 %v1515_v8  ;;  %459 = vperm.xlu0 %1426, %v1636_v16   ;;  %v91_v37 = vld [vmem:[%s2198_s2 + $0xb8] sm:$0xff]  ;;  %v93_v40 = vld [vmem:[%s2198_s2 + $0xc8] sm:$0xff]  ;;  %v72_v43 = vld [vmem:[%s2198_s2 + $0x20] sm:$0xff] }
  0x26   :  { %637 = vperm.xlu1 %1430, %v85_v17   ;;  %v75_v38 = vld [vmem:[%s2198_s2 + $0x38] sm:$0xff]  ;;  %v77_v41 = vld [vmem:[%s2198_s2 + $0x48] sm:$0xff]  ;;  %v82_v50 = vld [vmem:[%s2198_s2 + $0x70] sm:$0xff] }
  0x27   :  { %v43_v39 = vld [vmem:[%s2197_s1 + $0x38] sm:$0xff]  ;;  %v97_v45 = vld [vmem:[%s2198_s2 + $0xe8] sm:$0xff]  ;;  %v90_v53 = vld [vmem:[%s2198_s2 + $0xb0] sm:$0xff] }
  0x28   :  { %v95_v42 = vld [vmem:[%s2198_s2 + $0xd8] sm:$0xff]  ;;  %v61_v46 = vld [vmem:[%s2197_s1 + $0xc8] sm:$0xff]  ;;  %v116_v54 = vld [vmem:[%s2200_s4] sm:$0xff] }
  0x29   :  { %395 = vperm.xlu0 %1426, %v1646_v18   ;;  %v79_v44 = vld [vmem:[%s2198_s2 + $0x58] sm:$0xff]  ;;  %v81_v47 = vld [vmem:[%s2198_s2 + $0x68] sm:$0xff]  ;;  %v118_v57 = vld [vmem:[%s2200_s4 + $0x10] sm:$0xff] }
  0x2a   :  { %175 = vperm.xlu1 %1430, %v39_v19   ;;  %v45_v60 = vld [vmem:[%s2197_s1 + $0x48] sm:$0xff]  ;;  %v120_v61 = vld [vmem:[%s2200_s4 + $0x20] sm:$0xff]  ;;  %v122_v0 = vld [vmem:[%s2200_s4 + $0x30] sm:$0xff] }
  0x2b   :  { %v126_v7 = vld [vmem:[%s2200_s4 + $0x50] sm:$0xff]  ;;  %v128_v11 = vld [vmem:[%s2200_s4 + $0x60] sm:$0xff] }
  0x2d   :  { %467 = vperm.xlu0 %1426, %v1655_v20  }
  0x2e   :  { %1431 = vset.pattern.permute.xlu1 %v1514_v3 }
  0x2f   :  { %367 = vperm.xlu1 %1431, %v39_v19  }
  0x31   :  { %403 = vperm.xlu0 %1426, %v1662_v21  }
  0x33   :  { %1432 = vset.pattern.permute.xlu1 %v1515_v8 }
  0x34   :  { %552 = vperm.xlu1 %1432, %v68_v22  }
  0x35   :  { %475 = vperm.xlu0 %1426, %v1671_v23  }
  0x38   :  { %260 = vperm.xlu1 %1432, %v56_v6   ;;  %v74_v6 = vld [vmem:[%s2198_s2 + $0x30] sm:$0xff] }
  0x39   :  { %411 = vperm.xlu0 %1426, %v1678_v24  }
  0x3c   :  { %265 = vperm.xlu1 %1432, %v57_v25  }
  0x3d   :  { %1455 = vset.pattern.permute.xlu0 %v1515_v8 }
  0x3e   :  { %240 = vperm.xlu0 %1455, %v52_v1  }
  0x40   :  { %1433 = vset.pattern.permute.xlu1 %v1514_v3 }
  0x41   :  { %439 = vperm.xlu1 %1433, %v57_v25  }
  0x42   :  { %245 = vperm.xlu0 %1455, %v53_v4  }
  0x45   :  { %1434 = vset.pattern.permute.xlu1 %v1515_v8 }
  0x46   :  { %642 = vperm.xlu1 %1434, %v86_v26   ;;  %160 = vperm.xlu0 %1455, %v1576_v2   ;;  %v124_v2 = vld [vmem:[%s2200_s4 + $0x40] sm:$0xff] }
  0x47   :  { %v92_v26 = vld [vmem:[%s2198_s2 + $0xc0] sm:$0xff] }
  0x4a   :  { %180 = vperm.xlu1 %1434, %v40_v9   ;;  %255 = vperm.xlu0 %1455, %v55_v14   ;;  %v63_v14 = vld [vmem:[%s2197_s1 + $0xd8] sm:$0xff] }
  0x4e   :  { %185 = vperm.xlu1 %1434, %v41_v27   ;;  %632 = vperm.xlu0 %1455, %v84_v28  }
  0x52   :  { %1435 = vset.pattern.permute.xlu1 %v1514_v3  ;;  %170 = vperm.xlu0 %1455, %v1587_v5  }
  0x53   :  { %375 = vperm.xlu1 %1435, %v41_v27   ;;  %v142_v27 = vld [vmem:[%s2202_s6 + $0x10] sm:$0xff] }
  0x56   :  { %557 = vperm.xlu0 %1455, %v69_v29  }
  0x57   :  { %1436 = vset.pattern.permute.xlu1 %v1515_v8 }
  0x58   :  { %562 = vperm.xlu1 %1436, %v70_v30   ;;  %v148_v30 = vld [vmem:[%s2203_s7] sm:$0xff] }
  0x5a   :  { %647 = vperm.xlu0 %1455, %v87_v31  }
  0x5c   :  { %270 = vperm.xlu1 %1436, %v1604_v10  }
  0x5e   :  { %567 = vperm.xlu0 %1455, %v71_v32  }
  0x60   :  { %275 = vperm.xlu1 %1436, %v59_v33  }
  0x62   :  { %657 = vperm.xlu0 %1455, %v89_v34   ;;  %v144_v34 = vld [vmem:[%s2202_s6 + $0x20] sm:$0xff] }
  0x64   :  { %1437 = vset.pattern.permute.xlu1 %v1514_v3 }
  0x65   :  { %447 = vperm.xlu1 %1437, %v59_v33   ;;  %v47_v33 = vld [vmem:[%s2197_s1 + $0x58] sm:$0xff] }
  0x66   :  { %577 = vperm.xlu0 %1455, %v73_v35   ;;  %v318_v35 = vlaneseq }
  0x69   :  { %1438 = vset.pattern.permute.xlu1 %v1515_v8 }
  0x6a   :  { %652 = vperm.xlu1 %1438, %v88_v36   ;;  %667 = vperm.xlu0 %1455, %v91_v37  }
  0x6e   :  { %190 = vperm.xlu1 %1438, %v1613_v12   ;;  %587 = vperm.xlu0 %1455, %v75_v38   ;;  %v1887_v38 = vshrl.u32 %v318_v35, 7 }
  0x72   :  { %195 = vperm.xlu1 %1438, %v43_v39   ;;  %677 = vperm.xlu0 %1455, %v93_v40   ;;  %v320_v40 = vsub.s32 0, %v1887_v38 }
  0x76   :  { %1439 = vset.pattern.permute.xlu1 %v1514_v3  ;;  %597 = vperm.xlu0 %1455, %v77_v41   ;;  %v146_v41 = vld [vmem:[%s2202_s6 + $0x30] sm:$0xff] }
  0x77   :  { %383 = vperm.xlu1 %1439, %v43_v39  }
  0x7a   :  { %687 = vperm.xlu0 %1455, %v95_v42   ;;  %v484_v42 = vsub.s32 1, %v1887_v38 }
  0x7b   :  { %1440 = vset.pattern.permute.xlu1 %v1515_v8 }
  0x7c   :  { %572 = vperm.xlu1 %1440, %v72_v43  }
  0x7e   :  { %607 = vperm.xlu0 %1455, %v79_v44   ;;  %v157_v44 = vld [vmem:[%s2196_s0] sm:$0x3] }
  0x80   :  { %280 = vperm.xlu1 %1440, %v1620_v13  }
  0x82   :  { %697 = vperm.xlu0 %1455, %v97_v45  }
  0x84   :  { %v1764_v48 = vpop.permute.xlu1 %419  ;;  %285 = vperm.xlu1 %1440, %v61_v46   ;;  %v1766_v49 = vpop.permute.xlu0 %355 }
  0x86   :  { %617 = vperm.xlu0 %1455, %v81_v47   ;;  %v1905_v47 = vrot.slane %v157_v44, %v320_v40 }
  0x88   :  { %v1771_v51 = vpop.permute.xlu1 %423  ;;  %1441 = vset.pattern.permute.xlu1 %v1514_v3  ;;  %v1774_v52 = vpop.permute.xlu0 %363 }
  0x89   :  { %455 = vperm.xlu1 %1441, %v61_v46   ;;  %v76_v46 = vld [vmem:[%s2198_s2 + $0x40] sm:$0xff] }
  0x8a   :  { %622 = vperm.xlu0 %1455, %v82_v50   ;;  %v147_v50 = vld [vmem:[%s2202_s6 + $0x38] sm:$0xff] }
  0x8c   :  { %v1782_v55 = vpop.permute.xlu0 %435 }
  0x8d   :  { %1442 = vset.pattern.permute.xlu1 %v1515_v8  ;;  %v1785_v56 = vpop.permute.xlu1 %165 }
  0x8e   :  { %662 = vperm.xlu1 %1442, %v90_v53   ;;  %792 = vperm.xlu0 %1455, %v116_v54   ;;  %v1911_v53 = vrot.slane %v157_v44, %v484_v42 }
  0x90   :  { %v1790_v58 = vpop.permute.xlu0 %371 }
  0x92   :  { %200 = vperm.xlu1 %1442, %v1630_v15   ;;  %v1793_v59 = vpop.permute.xlu1 %359  ;;  %802 = vperm.xlu0 %1455, %v118_v57   ;;  %v130_v15 = vld [vmem:[%s2200_s4 + $0x70] sm:$0xff] }
  0x93   :  { %v487_v35 = vmul.f32 %v1911_v53, %v1793_v59 }
  0x94   :  { %v1801_v62 = vpop.permute.xlu0 %443 }
  0x96   :  { %205 = vperm.xlu1 %1442, %v45_v60   ;;  %812 = vperm.xlu0 %1455, %v120_v61   ;;  %v503_v61 = vmul.f32 %v1911_v53, %v1771_v51  ;;  %v502_v51 = vmul.f32 %v1911_v53, %v1764_v48 }
  0x97   :  { %v1803_v63 = vpop.permute.xlu1 %250 }
  0x98   :  { %v1808_v1 = vpop.permute.xlu0 %379  ;;  %v340_v59 = vmul.f32 %v1905_v47, %v1803_v63 }
  0x9a   :  { %1443 = vset.pattern.permute.xlu1 %v1514_v3  ;;  %822 = vperm.xlu0 %1455, %v122_v0   ;;  %v154_v0 = vld [vmem:[%s2203_s7 + $0x30] sm:$0xff] }
  0x9b   :  { %391 = vperm.xlu1 %1443, %v45_v60  }
  0x9c   :  { %v1814_v4 = vpop.permute.xlu1 %427  ;;  %v1816_v5 = vpop.permute.xlu0 %451 }
  0x9e   :  { %832 = vperm.xlu0 %1455, %v124_v2  }
  0x9f   :  { %1444 = vset.pattern.permute.xlu1 %v1515_v8 }
  0xa0   :  { %582 = vperm.xlu1 %1444, %v74_v6   ;;  %v1825_v9 = vpop.permute.xlu1 %431  ;;  %v1827_v10 = vpop.permute.xlu0 %387 }
  0xa2   :  { %842 = vperm.xlu0 %1455, %v126_v7  }
  0xa4   :  { %290 = vperm.xlu1 %1444, %v1636_v16   ;;  %v1833_v12 = vpop.permute.xlu0 %459  ;;  %v140_v16 = vld [vmem:[%s2202_s6] sm:$0xff] }
  0xa5   :  { %v1835_v13 = vpop.permute.xlu1 %637 }
  0xa6   :  { %852 = vperm.xlu0 %1455, %v128_v11  }
  0xa8   :  { %295 = vperm.xlu1 %1444, %v63_v14   ;;  %v1843_v17 = vpop.permute.xlu0 %395 }
  0xa9   :  { %v1845_v19 = vpop.permute.xlu1 %175 }
  0xaa   :  { %862 = vperm.xlu0 %1455, %v130_v15   ;;  %v156_v15 = vld [vmem:[#allocation2] sm:$0x1] }
  0xac   :  { %1445 = vset.pattern.permute.xlu1 %v1514_v3  ;;  %v1851_v22 = vpop.permute.xlu0 %467 }
  0xad   :  { %463 = vperm.xlu1 %1445, %v63_v14   ;;  %v65_v14 = vld [vmem:[%s2197_s1 + $0xe8] sm:$0xff] }
  0xae   :  { %v1853_v25 = vpop.permute.xlu1 %367  ;;  %1073 = vperm.xlu0 %1455, %v140_v16   ;;  %v486_v16 = vmul.f32 %v1911_v53, %v1766_v49  ;;  %v504_v49 = vmul.f32 %v1911_v53, %v1814_v4 }
  0xb0   :  { %v1861_v28 = vpop.permute.xlu0 %403 }
  0xb1   :  { %1446 = vset.pattern.permute.xlu1 %v1515_v8 }
  0xb2   :  { %672 = vperm.xlu1 %1446, %v92_v26   ;;  %1083 = vperm.xlu0 %1455, %v142_v27  }
  0xb3   :  { %v1864_v29 = vpop.permute.xlu1 %552 }
  0xb4   :  { %v1869_v31 = vpop.permute.xlu0 %475 }
  0xb6   :  { %210 = vperm.xlu1 %1446, %v1646_v18   ;;  %1210 = vperm.xlu0 %1455, %v148_v30   ;;  %v145_v18 = vld [vmem:[%s2202_s6 + $0x28] sm:$0xff] }
  0xb7   :  { %v1872_v32 = vpop.permute.xlu1 %260 }
  0xb8   :  { %v1880_v36 = vpop.permute.xlu0 %411 }
  0xba   :  { %215 = vperm.xlu1 %1446, %v47_v33   ;;  %1093 = vperm.xlu0 %1455, %v144_v34  }
  0xbb   :  { %v1882_v37 = vpop.permute.xlu1 %265 }
  0xbd   :  { %v241_v39 = vpop.permute.xlu0 %240 }
  0xbe   :  { %1447 = vset.pattern.permute.xlu1 %v1514_v3  ;;  %1098 = vperm.xlu0 %1455, %v145_v18   ;;  %v338_v2 = vmul.f32 %v1905_v47, %v241_v39 }
  0xbf   :  { %399 = vperm.xlu1 %1447, %v47_v33  }
  0xc0   :  { %v1895_v43 = vpop.permute.xlu1 %439  ;;  %v534_v27 = vadd.f32 %v502_v51, %v338_v2 }
  0xc1   :  { %v246_v45 = vpop.permute.xlu0 %245 }
  0xc2   :  { %1103 = vperm.xlu0 %1455, %v146_v41   ;;  %v339_v54 = vmul.f32 %v1905_v47, %v246_v45  ;;  %v488_v45 = vmul.f32 %v1911_v53, %v1774_v52  ;;  %v505_v52 = vmul.f32 %v1911_v53, %v1825_v9 }
  0xc3   :  { %1448 = vset.pattern.permute.xlu1 %v1515_v8 }
  0xc4   :  { %592 = vperm.xlu1 %1448, %v76_v46   ;;  %v535_v6 = vadd.f32 %v503_v61, %v339_v54  ;;  %v94_v46 = vld [vmem:[%s2198_s2 + $0xd0] sm:$0xff] }
  0xc5   :  { %v643_v57 = vpop.permute.xlu1 %642  ;;  %v161_v60 = vpop.permute.xlu0 %160 }
  0xc6   :  { %1108 = vperm.xlu0 %1455, %v147_v50   ;;  %v322_v26 = vmul.f32 %v1905_v47, %v161_v60  ;;  %v536_v60 = vadd.f32 %v504_v49, %v340_v59 }
  0xc8   :  { %300 = vperm.xlu1 %1448, %v1655_v20   ;;  %v727_v20 = vadd.f32 %v1835_v13, %v535_v6  ;;  %v518_v48 = vadd.f32 %v486_v16, %v322_v26  ;;  %v323_v13 = vmul.f32 %v1905_v47, %v1785_v56  ;;  %v728_v2 = vadd.f32 %v643_v57, %v536_v60 }
  0xc9   :  { %v1921_v7 = vpop.permute.xlu1 %180  ;;  %v256_v11 = vpop.permute.xlu0 %255 }
  0xca   :  { %1240 = vperm.xlu0 %1455, %v154_v0   ;;  %v759_v39 = vmax.f32 %v727_v20, 0.0  ;;  %v341_v4 = vmul.f32 %v1905_v47, %v256_v11  ;;  %v519_v54 = vadd.f32 %v487_v35, %v323_v13  ;;  %v710_v56 = vadd.f32 %v1864_v29, %v518_v48 }
  0xcb   :  { %v489_v0 = vmul.f32 %v1911_v53, %v1853_v25  ;;  %v325_v29 = vmul.f32 %v1905_v47, %v1845_v19  ;;  %v49_v25 = vld [vmem:[%s2197_s1 + $0x68] sm:$0xff]  ;;  %v760_v57 = vmax.f32 %v728_v2, 0.0  ;;  %v506_v13 = vmul.f32 %v1911_v53, %v1782_v55 }
  0xcc   :  { %305 = vperm.xlu1 %1448, %v65_v14   ;;  %v537_v51 = vadd.f32 %v505_v52, %v341_v4  ;;  %v490_v2 = vmul.f32 %v1911_v53, %v1790_v58 }
  0xcd   :  { %v1932_v30 = vpop.permute.xlu1 %185  ;;  %v633_v33 = vpop.permute.xlu0 %632 }
  0xce   :  { %v726_v34 = vadd.f32 %v633_v33, %v534_v27  ;;  %1271 = vperm.xlu0 %1455, %v156_v15   ;;  %v742_v15 = vmax.f32 %v710_v56, 0.0 }
  0xd0   :  { %v758_v18 = vmax.f32 %v726_v34, 0.0  ;;  %1449 = vset.pattern.permute.xlu1 %v1514_v3  ;;  %v521_v34 = vadd.f32 %v489_v0, %v325_v29 }
  0xd1   :  { %471 = vperm.xlu1 %1449, %v65_v14   ;;  %v171_v41 = vpop.permute.xlu0 %170 }
  0xd2   :  { %v1941_v42 = vpop.permute.xlu1 %375  ;;  %v782_v44 = vpack.c.bf16 %v759_v39, %v758_v18  ;;  %v324_v50 = vmul.f32 %v1905_v47, %v171_v41 }
  0xd3   :  { %v491_v0 = vmul.f32 %v1911_v53, %v1941_v42 }
  0xd4   :  { %1321 = vmatprep.subr.bf16.mxu0 %v782_v44  ;;  %v520_v11 = vadd.f32 %v488_v45, %v324_v50  ;;  %v342_v44 = vmul.f32 %v1905_v47, %v1872_v32  ;;  %v343_v45 = vmul.f32 %v1905_v47, %v1882_v37 }
  0xd5   :  { %1450 = vset.pattern.permute.xlu1 %v1515_v8  ;;  %v558_v61 = vpop.permute.xlu0 %557 }
  0xd6   :  { %v711_v63 = vadd.f32 %v558_v61, %v519_v54  ;;  %682 = vperm.xlu1 %1450, %v94_v46   ;;  %v538_v54 = vadd.f32 %v506_v13, %v342_v44  ;;  %v67_v61 = vld [vmem:[%s2197_s1 + $0xf8] sm:$0xff] }
  0xd7   :  { %v563_v6 = vpop.permute.xlu1 %562  ;;  %v99_v44 = vld [vmem:[%s2198_s2 + $0xf8] sm:$0xff] }
  0xd8   :  { %v743_v14 = vmax.f32 %v711_v63, 0.0  ;;  %v712_v20 = vadd.f32 %v563_v6, %v520_v11  ;;  %v327_v6 = vmul.f32 %v1905_v47, %v1932_v30  ;;  %v51_v30 = vld [vmem:[%s2197_s1 + $0x78] sm:$0xff] }
  0xd9   :  { %v648_v16 = vpop.permute.xlu0 %647 }
  0xda   :  { %v729_v26 = vadd.f32 %v648_v16, %v537_v51  ;;  %220 = vperm.xlu1 %1450, %v1662_v21   ;;  %v774_v27 = vpack.c.bf16 %v743_v14, %v742_v15  ;;  %v744_v39 = vmax.f32 %v712_v20, 0.0  ;;  %v507_v21 = vmul.f32 %v1911_v53, %v1895_v43  ;;  %v78_v43 = vld [vmem:[%s2198_s2 + $0x50] sm:$0xff]  ;;  %v96_v51 = vld [vmem:[%s2198_s2 + $0xe0] sm:$0xff] }
  0xdb   :  { %v1961_v9 = vpop.permute.xlu1 %270  ;;  %v523_v15 = vadd.f32 %v491_v0, %v327_v6 }
  0xdc   :  { %v761_v33 = vmax.f32 %v729_v26, 0.0  ;;  %1322 = vmatpush3.bf16.msra.mxu0 %v774_v27  ;;  %v539_v4 = vadd.f32 %v507_v21, %v343_v45 }
  0xdd   :  { %v568_v35 = vpop.permute.xlu0 %567 }
  0xde   :  { %v783_v48 = vpack.c.bf16 %v761_v33, %v760_v57  ;;  %v713_v18 = vadd.f32 %v568_v35, %v521_v34  ;;  %225 = vperm.xlu1 %1450, %v49_v25   ;;  %v344_v34 = vmul.f32 %v1905_v47, %v1961_v9 }
  0xdf   :  { %v276_v19 = vpop.permute.xlu1 %275 }
  0xe0   :  { %v745_v49 = vmax.f32 %v713_v18, 0.0  ;;  %1323 = vmatprep.subr.bf16.mxu0 %v783_v48  ;;  %v345_v33 = vmul.f32 %v1905_v47, %v276_v19 }
  0xe1   :  { %v658_v46 = vpop.permute.xlu0 %657 }
  0xe2   :  { %v775_v41 = vpack.c.bf16 %v745_v49, %v744_v39  ;;  %1451 = vset.pattern.permute.xlu1 %v1514_v3  ;;  %v731_v50 = vadd.f32 %v658_v46, %v539_v4  ;;  %v80_v39 = vld [vmem:[%s2198_s2 + $0x60] sm:$0xff]  ;;  %v117_v4 = vld [vmem:[%s2200_s4 + $0x8] sm:$0xff] }
  0xe3   :  { %407 = vperm.xlu1 %1451, %v49_v25  }
  0xe4   :  { %v448_v59 = vpop.permute.xlu1 %447  ;;  %1324 = vmatpush3.bf16.msra.mxu0 %v775_v41  ;;  %v763_v60 = vmax.f32 %v731_v50, 0.0  ;;  %v492_v50 = vmul.f32 %v1911_v53, %v1808_v1  ;;  %v121_v1 = vld [vmem:[%s2200_s4 + $0x28] sm:$0xff] }
  0xe5   :  { %v578_v14 = vpop.permute.xlu0 %577  ;;  %v509_v20 = vmul.f32 %v1911_v53, %v448_v59  ;;  %v83_v59 = vld [vmem:[%s2198_s2 + $0x78] sm:$0xff] }
  0xe6   :  { %v715_v42 = vadd.f32 %v578_v14, %v523_v15  ;;  %v123_v14 = vld [vmem:[%s2200_s4 + $0x38] sm:$0xff] }
  0xe7   :  { %1452 = vset.pattern.permute.xlu1 %v1515_v8  ;;  %v541_v35 = vadd.f32 %v509_v20, %v345_v33 }
  0xe8   :  { %602 = vperm.xlu1 %1452, %v78_v43   ;;  %v747_v26 = vmax.f32 %v715_v42, 0.0  ;;  %v125_v42 = vld [vmem:[%s2200_s4 + $0x48] sm:$0xff] }
  0xe9   :  { %v653_v55 = vpop.permute.xlu1 %652  ;;  %v668_v18 = vpop.permute.xlu0 %667 }
  0xea   :  { %v730_v56 = vadd.f32 %v653_v55, %v538_v54  ;;  %v733_v49 = vadd.f32 %v668_v18, %v541_v35 }
  0xec   :  { %v762_v32 = vmax.f32 %v730_v56, 0.0  ;;  %310 = vperm.xlu1 %1452, %v1671_v23   ;;  %v326_v23 = vmul.f32 %v1905_v47, %v1921_v7  ;;  %v765_v41 = vmax.f32 %v733_v49, 0.0  ;;  %v141_v49 = vld [vmem:[%s2202_s6 + $0x8] sm:$0xff] }
  0xed   :  { %v1980_v37 = vpop.permute.xlu1 %190 }
  0xee   :  { %v784_v52 = vpack.c.bf16 %v763_v60, %v762_v32  ;;  %v522_v16 = vadd.f32 %v490_v2, %v326_v23  ;;  %v328_v54 = vmul.f32 %v1905_v47, %v1980_v37  ;;  %v588_v60 = vpop.permute.xlu0 %587  ;;  %v119_v32 = vld [vmem:[%s2200_s4 + $0x18] sm:$0xff] }
  0xf0   :  { %315 = vperm.xlu1 %1452, %v67_v61   ;;  %1325 = vmatprep.subr.bf16.mxu0 %v784_v52 }
  0xf1   :  { %v196_v63 = vpop.permute.xlu1 %195 }
  0xf2   :  { %v329_v43 = vmul.f32 %v1905_v47, %v196_v63  ;;  %v1460_v63 = vld [vmem:[%s2199_s3 + $0x4] ss:$8 sps:$4 sm:$0xff]  }
  0xf3   :  { %982 = vmatprep.mubr.bf16.mxu0 %v1460_v63 }
  0xf4   :  { %1453 = vset.pattern.permute.xlu1 %v1514_v3 }
  0xf5   :  { %479 = vperm.xlu1 %1453, %v67_v61   ;;  %v524_v61 = vadd.f32 %v492_v50, %v328_v54 }
  0xf6   :  { %v384_v11 = vpop.permute.xlu1 %383 }
  0xf7   :  { %v493_v46 = vmul.f32 %v1911_v53, %v384_v11 }
  0xf9   :  { %1454 = vset.pattern.permute.xlu1 %v1515_v8  ;;  %v525_v55 = vadd.f32 %v493_v46, %v329_v43 }
  0xfa   :  { %692 = vperm.xlu1 %1454, %v96_v51  }
  0xfb   :  { %v573_v29 = vpop.permute.xlu1 %572  ;;  %v717_v52 = vadd.f32 %v588_v60, %v525_v55 }
  0xfc   :  { %v714_v58 = vadd.f32 %v573_v29, %v522_v16  ;;  %v510_v29 = vmul.f32 %v1911_v53, %v1816_v5 }
  0xfd   :  { %v749_v23 = vmax.f32 %v717_v52, 0.0 }
  0xfe   :  { %v746_v27 = vmax.f32 %v714_v58, 0.0  ;;  %230 = vperm.xlu1 %1454, %v1678_v24   ;;  %v508_v24 = vmul.f32 %v1911_v53, %v1801_v62  ;;  %v98_v62 = vld [vmem:[%s2198_s2 + $0xf0] sm:$0xff] }
  0xff   :  { %v1999_v7 = vpop.permute.xlu1 %280 }
 0x100   :  { %v776_v25 = vpack.c.bf16 %v747_v26, %v746_v27  ;;  %v540_v19 = vadd.f32 %v508_v24, %v344_v34  ;;  %v346_v58 = vmul.f32 %v1905_v47, %v1999_v7 }
 0x102   :  { %235 = vperm.xlu1 %1454, %v51_v30   ;;  %1326 = vmatpush3.bf16.msra.mxu0 %v776_v25  ;;  %v678_v25 = vpop.permute.xlu0 %677  ;;  %v542_v33 = vadd.f32 %v510_v29, %v346_v58 }
 0x103   :  { %v286_v57 = vpop.permute.xlu1 %285 }
 0x104   :  { %v347_v16 = vmul.f32 %v1905_v47, %v286_v57  ;;  %v129_v57 = vld [vmem:[%s2200_s4 + $0x68] sm:$0xff] }
 0x106   :  { %1456 = vset.pattern.permute.xlu1 %v1514_v3 }
 0x107   :  { %415 = vperm.xlu1 %1456, %v51_v30   ;;  %v127_v30 = vld [vmem:[%s2200_s4 + $0x58] sm:$0xff] }
 0x108   :  { %v456_v48 = vpop.permute.xlu1 %455 }
 0x109   :  { %v511_v15 = vmul.f32 %v1911_v53, %v456_v48  ;;  %v131_v48 = vld [vmem:[%s2200_s4 + $0x78] sm:$0xff] }
 0x10b   :  { %1457 = vset.pattern.permute.xlu1 %v1515_v8  ;;  %v543_v26 = vadd.f32 %v511_v15, %v347_v16 }
 0x10c   :  { %612 = vperm.xlu1 %1457, %v80_v39  }
 0x10d   :  { %v663_v3 = vpop.permute.xlu1 %662  ;;  %v735_v20 = vadd.f32 %v678_v25, %v543_v26 }
 0x10e   :  { %v732_v21 = vadd.f32 %v663_v3, %v540_v19 }
 0x10f   :  { %v767_v35 = vmax.f32 %v735_v20, 0.0 }
 0x110   :  { %v764_v9 = vmax.f32 %v732_v21, 0.0  ;;  %702 = vperm.xlu1 %1457, %v98_v62   ;;  %v143_v62 = vld [vmem:[%s2202_s6 + $0x18] sm:$0xff]  ;;  %v494_v21 = vmul.f32 %v1911_v53, %v1827_v10  ;;  %v150_v10 = vld [vmem:[%s2203_s7 + $0x10] sm:$0xff] }
 0x111   :  { %v2018_v13 = vpop.permute.xlu1 %200 }
 0x112   :  { %v785_v45 = vpack.c.bf16 %v765_v41, %v764_v9  ;;  %v330_v41 = vmul.f32 %v1905_v47, %v2018_v13 }
 0x114   :  { %707 = vperm.xlu1 %1457, %v99_v44   ;;  %1327 = vmatprep.subr.bf16.mxu0 %v785_v45  ;;  %v598_v45 = vpop.permute.xlu0 %597  ;;  %v526_v46 = vadd.f32 %v494_v21, %v330_v41 }
 0x115   :  { %v206_v8 = vpop.permute.xlu1 %205 }
 0x116   :  { %v331_v3 = vmul.f32 %v1905_v47, %v206_v8 }
 0x118   :  { %627 = vperm.xlu1 %1457, %v83_v59   ;;  %v149_v59 = vld [vmem:[%s2203_s7 + $0x8] sm:$0xff] }
 0x11a   :  { %v392_v56 = vpop.permute.xlu1 %391 }
 0x11b   :  { %v495_v19 = vmul.f32 %v1911_v53, %v392_v56  ;;  %v151_v56 = vld [vmem:[%s2203_s7 + $0x18] sm:$0xff] }
 0x11c   :  { %797 = vperm.xlu1 %1457, %v117_v4  }
 0x11d   :  { %v527_v9 = vadd.f32 %v495_v19, %v331_v3 }
 0x11f   :  { %v583_v0 = vpop.permute.xlu1 %582  ;;  %v719_v8 = vadd.f32 %v598_v45, %v527_v9 }
 0x120   :  { %v716_v2 = vadd.f32 %v583_v0, %v524_v61  ;;  %807 = vperm.xlu1 %1457, %v119_v32   ;;  %v152_v61 = vld [vmem:[%s2203_s7 + $0x20] sm:$0xff] }
 0x121   :  { %v751_v54 = vmax.f32 %v719_v8, 0.0 }
 0x122   :  { %v748_v37 = vmax.f32 %v716_v2, 0.0 }
 0x123   :  { %v291_v6 = vpop.permute.xlu1 %290 }
 0x124   :  { %v777_v11 = vpack.c.bf16 %v749_v23, %v748_v37  ;;  %817 = vperm.xlu1 %1457, %v121_v1   ;;  %v348_v63 = vmul.f32 %v1905_v47, %v291_v6  ;;  %v153_v1 = vld [vmem:[%s2203_s7 + $0x28] sm:$0xff]  ;;  %v512_v37 = vmul.f32 %v1911_v53, %v1833_v12  ;;  %v688_v23 = vpop.permute.xlu0 %687 }
 0x126   :  { %1328 = vmatpush3.bf16.msra.mxu0 %v777_v11 }
 0x127   :  { %v296_v51 = vpop.permute.xlu1 %295 }
 0x128   :  { %827 = vperm.xlu1 %1457, %v123_v14   ;;  %v349_v52 = vmul.f32 %v1905_v47, %v296_v51  ;;  %v544_v14 = vadd.f32 %v512_v37, %v348_v63  ;;  %v155_v51 = vld [vmem:[%s2203_s7 + $0x38] sm:$0xff] }
 0x12c   :  { %837 = vperm.xlu1 %1457, %v125_v42   ;;  %v464_v27 = vpop.permute.xlu1 %463 }
 0x12d   :  { %v513_v32 = vmul.f32 %v1911_v53, %v464_v27 }
 0x12f   :  { %v545_v0 = vadd.f32 %v513_v32, %v349_v52 }
 0x130   :  { %847 = vperm.xlu1 %1457, %v127_v30  }
 0x131   :  { %v673_v24 = vpop.permute.xlu1 %672  ;;  %v737_v11 = vadd.f32 %v688_v23, %v545_v0 }
 0x132   :  { %v734_v5 = vadd.f32 %v673_v24, %v542_v33  ;;  %v496_v33 = vmul.f32 %v1911_v53, %v1843_v17  ;;  %v608_v24 = vpop.permute.xlu0 %607  ;;  %v514_v17 = vmul.f32 %v1911_v53, %v1851_v22  ;;  %v498_v22 = vmul.f32 %v1911_v53, %v1861_v28 }
 0x133   :  { %v769_v16 = vmax.f32 %v737_v11, 0.0  ;;  %v500_v28 = vmul.f32 %v1911_v53, %v1880_v36 }
 0x134   :  { %v766_v34 = vmax.f32 %v734_v5, 0.0  ;;  %857 = vperm.xlu1 %1457, %v129_v57  }
 0x135   :  { %v211_v7 = vpop.permute.xlu1 %210 }
 0x136   :  { %v786_v18 = vpack.c.bf16 %v767_v35, %v766_v34  ;;  %v332_v30 = vmul.f32 %v1905_v47, %v211_v7  ;;  %v698_v9 = vpop.permute.xlu0 %697 }
 0x138   :  { %867 = vperm.xlu1 %1457, %v131_v48   ;;  %1329 = vmatprep.subr.bf16.mxu0 %v786_v18  ;;  %v528_v5 = vadd.f32 %v496_v33, %v332_v30 }
 0x139   :  { %v216_v39 = vpop.permute.xlu1 %215 }
 0x13a   :  { %v333_v12 = vmul.f32 %v1905_v47, %v216_v39  ;;  %v618_v32 = vpop.permute.xlu0 %617 }
 0x13c   :  { %1078 = vperm.xlu1 %1457, %v141_v49  }
 0x13e   :  { %v400_v44 = vpop.permute.xlu1 %399  ;;  %v623_v30 = vpop.permute.xlu0 %622 }
 0x13f   :  { %v497_v27 = vmul.f32 %v1911_v53, %v400_v44 }
 0x140   :  { %1088 = vperm.xlu1 %1457, %v143_v62  }
 0x141   :  { %v529_v25 = vadd.f32 %v497_v27, %v333_v12 }
 0x143   :  { %v593_v43 = vpop.permute.xlu1 %592  ;;  %v721_v57 = vadd.f32 %v608_v24, %v529_v25 }
 0x144   :  { %v718_v4 = vadd.f32 %v593_v43, %v526_v46  ;;  %1215 = vperm.xlu1 %1457, %v149_v59  }
 0x145   :  { %v753_v18 = vmax.f32 %v721_v57, 0.0 }
 0x146   :  { %v750_v50 = vmax.f32 %v718_v4, 0.0 }
 0x147   :  { %v301_v13 = vpop.permute.xlu1 %300 }
 0x148   :  { %v778_v55 = vpack.c.bf16 %v751_v54, %v750_v50  ;;  %1220 = vperm.xlu1 %1457, %v150_v10   ;;  %v350_v62 = vmul.f32 %v1905_v47, %v301_v13 }
 0x14a   :  { %1330 = vmatpush3.bf16.msra.mxu0 %v778_v55  ;;  %v546_v45 = vadd.f32 %v514_v17, %v350_v62  ;;  %v1472_v62 = vld [vmem:[%s2199_s3 + $0x40] ss:$8 sps:$4 sm:$0xff]   ;;  %v1476_v17 = vld [vmem:[%s2199_s3 + $0x64] ss:$8 sps:$4 sm:$0xff]  }
 0x14b   :  { %v306_v60 = vpop.permute.xlu1 %305 }
 0x14c   :  { %1225 = vperm.xlu1 %1457, %v151_v56   ;;  %v351_v7 = vmul.f32 %v1905_v47, %v306_v60 }
 0x150   :  { %1230 = vperm.xlu1 %1457, %v152_v61   ;;  %v472_v2 = vpop.permute.xlu1 %471 }
 0x151   :  { %v515_v39 = vmul.f32 %v1911_v53, %v472_v2 }
 0x153   :  { %v547_v21 = vadd.f32 %v515_v39, %v351_v7  ;;  %v1469_v39 = vld [vmem:[%s2199_s3 + $0x30] ss:$8 sps:$4 sm:$0xff]   ;;  %v1470_v7 = vld [vmem:[%s2199_s3 + $0x44] ss:$8 sps:$4 sm:$0xff]  }
 0x154   :  { %1235 = vperm.xlu1 %1457, %v153_v1   ;;  %v516_v1 = vmul.f32 %v1911_v53, %v1869_v31 }
 0x155   :  { %v683_v15 = vpop.permute.xlu1 %682  ;;  %v739_v44 = vadd.f32 %v698_v9, %v547_v21  ;;  %v1473_v21 = vld [vmem:[%s2199_s3 + $0x54] ss:$8 sps:$4 sm:$0xff]   ;;  %v1478_v9 = vld [vmem:[%s2199_s3 + $0x60] ss:$8 sps:$4 sm:$0xff]  }
 0x156   :  { %v736_v6 = vadd.f32 %v683_v15, %v544_v14 }
 0x157   :  { %v771_v43 = vmax.f32 %v739_v44, 0.0  ;;  %v1479_v44 = vld [vmem:[%s2199_s3 + $0x74] ss:$8 sps:$4 sm:$0xff]  }
 0x158   :  { %v768_v42 = vmax.f32 %v736_v6, 0.0  ;;  %1245 = vperm.xlu1 %1457, %v155_v51  }
 0x159   :  { %v221_v29 = vpop.permute.xlu1 %220 }
 0x15a   :  { %v787_v58 = vpack.c.bf16 %v769_v16, %v768_v42  ;;  %v334_v55 = vmul.f32 %v1905_v47, %v221_v29 }
 0x15c   :  { %1331 = vmatprep.subr.bf16.mxu0 %v787_v58  ;;  %v530_v52 = vadd.f32 %v498_v22, %v334_v55 }
 0x15d   :  { %v226_v26 = vpop.permute.xlu1 %225 }
 0x15e   :  { %v335_v13 = vmul.f32 %v1905_v47, %v226_v26 }
 0x162   :  { %v408_v20 = vpop.permute.xlu1 %407 }
 0x163   :  { %v499_v54 = vmul.f32 %v1911_v53, %v408_v20 }
 0x165   :  { %v531_v56 = vadd.f32 %v499_v54, %v335_v13 }
 0x167   :  { %v603_v34 = vpop.permute.xlu1 %602  ;;  %v723_v61 = vadd.f32 %v618_v32, %v531_v56 }
 0x168   :  { %v720_v35 = vadd.f32 %v603_v34, %v528_v5 }
 0x169   :  { %v755_v14 = vmax.f32 %v723_v61, 0.0 }
 0x16a   :  { %v752_v48 = vmax.f32 %v720_v35, 0.0 }
 0x16b   :  { %v311_v49 = vpop.permute.xlu1 %310 }
 0x16c   :  { %v779_v19 = vpack.c.bf16 %v753_v18, %v752_v48  ;;  %v352_v0 = vmul.f32 %v1905_v47, %v311_v49  ;;  %v1463_v18 = vld [vmem:[%s2199_s3 + $0x10] ss:$8 sps:$4 sm:$0xff]   ;;  %v1464_v49 = vld [vmem:[%s2199_s3 + $0x24] ss:$8 sps:$4 sm:$0xff]  }
 0x16e   :  { %1332 = vmatpush3.bf16.msra.mxu0 %v779_v19  ;;  %v548_v42 = vadd.f32 %v516_v1, %v352_v0  ;;  %v1466_v19 = vld [vmem:[%s2199_s3 + $0x20] ss:$8 sps:$4 sm:$0xff]  }
 0x16f   :  { %v316_v3 = vpop.permute.xlu1 %315 }
 0x170   :  { %v353_v51 = vmul.f32 %v1905_v47, %v316_v3  ;;  %v1467_v3 = vld [vmem:[%s2199_s3 + $0x34] ss:$8 sps:$4 sm:$0xff]  }
 0x174   :  { %v480_v41 = vpop.permute.xlu1 %479 }
 0x175   :  { %v517_v37 = vmul.f32 %v1911_v53, %v480_v41  ;;  %v1475_v41 = vld [vmem:[%s2199_s3 + $0x50] ss:$8 sps:$4 sm:$0xff]  }
 0x177   :  { %v549_v31 = vadd.f32 %v517_v37, %v353_v51 }
 0x179   :  { %v693_v59 = vpop.permute.xlu1 %692 }
 0x17a   :  { %v738_v8 = vadd.f32 %v693_v59, %v546_v45  ;;  %v1481_v45 = vld [vmem:[%s2199_s3 + $0x70] ss:$8 sps:$4 sm:$0xff]   ;;  %v1482_v59 = vld [vmem:[%s2201_s5] sm:$0xff]  }
 0x17b   :  { %1413 = vmatprep.mubr.bf16.mxu1 %v1482_v59 }
 0x17c   :  { %v770_v46 = vmax.f32 %v738_v8, 0.0 }
 0x17d   :  { %v231_v4 = vpop.permute.xlu1 %230 }
 0x17e   :  { %v788_v10 = vpack.c.bf16 %v771_v43, %v770_v46  ;;  %v336_v23 = vmul.f32 %v1905_v47, %v231_v4 }
 0x180   :  { %1333 = vmatprep.subr.bf16.mxu0 %v788_v10  ;;  %v532_v16 = vadd.f32 %v500_v28, %v336_v23  ;;  %v793_v10 = vpop.permute.xlu0 %792 }
 0x181   :  { %v236_v50 = vpop.permute.xlu1 %235 }
 0x182   :  { %v337_v27 = vmul.f32 %v1905_v47, %v236_v50  ;;  %v724_v25 = vadd.f32 %v623_v30, %v532_v16  ;;  %v1461_v47 = vld [vmem:[%s2199_s3 + $0x14] ss:$8 sps:$4 sm:$0xff]  }
 0x184   :  { %v756_v34 = vmax.f32 %v724_v25, 0.0 }
 0x186   :  { %v416_v60 = vpop.permute.xlu1 %415 }
 0x187   :  { %v501_v29 = vmul.f32 %v1911_v53, %v416_v60  ;;  %v1458_v53 = vld [vmem:[%s2199_s3] ss:$8 sps:$4 sm:$0xff]  }
 0x189   :  { %v533_v24 = vadd.f32 %v501_v29, %v337_v27 }
 0x18b   :  { %v613_v63 = vpop.permute.xlu1 %612 }
 0x18c   :  { %v722_v2 = vadd.f32 %v613_v63, %v530_v52 }
 0x18e   :  { %v754_v11 = vmax.f32 %v722_v2, 0.0  ;;  %v803_v2 = vpop.permute.xlu0 %802 }
 0x18f   :  { %v703_v15 = vpop.permute.xlu1 %702 }
 0x190   :  { %v780_v6 = vpack.c.bf16 %v755_v14, %v754_v11  ;;  %v740_v58 = vadd.f32 %v703_v15, %v548_v42 }
 0x192   :  { %1334 = vmatpush3.bf16.msra.mxu0 %v780_v6  ;;  %v772_v20 = vmax.f32 %v740_v58, 0.0  ;;  %v813_v58 = vpop.permute.xlu0 %812 }
 0x193   :  { %v708_v26 = vpop.permute.xlu1 %707 }
 0x194   :  { %v741_v12 = vadd.f32 %v708_v26, %v549_v31 }
 0x196   :  { %v773_v33 = vmax.f32 %v741_v12, 0.0 }
 0x197   :  { %v628_v36 = vpop.permute.xlu1 %627 }
 0x198   :  { %v789_v57 = vpack.c.bf16 %v773_v33, %v772_v20  ;;  %v725_v5 = vadd.f32 %v628_v36, %v533_v24 }
 0x19a   :  { %v757_v35 = vmax.f32 %v725_v5, 0.0  ;;  %1335 = vmatprep.subr.bf16.mxu0 %v789_v57 }
 0x19b   :  { %v798_v55 = vpop.permute.xlu1 %797 }
 0x19c   :  { %v781_v48 = vpack.c.bf16 %v757_v35, %v756_v34  ;;  %v823_v34 = vpop.permute.xlu0 %822 }
 0x19e   :  { %1336 = vmatpush3.bf16.msra.mxu0 %v781_v48 }
 0x19f   :  { %v808_v11 = vpop.permute.xlu1 %807 }
 0x1a1   :  { %983 = vmatmul.mubr.bf16.vlgmr.msra.gmra.mrb[0].mxu0 %v1458_v53 }
 0x1a2   :  { %990 = vmatprep.mubr.bf16.mxu0 %v1461_v47 }
 0x1a3   :  { %v818_v12 = vpop.permute.xlu1 %817 }
 0x1a7   :  { %v828_v47 = vpop.permute.xlu1 %827 }
 0x1a9   :  { %991 = vmatmul.mubr.bf16.gmra.mrb[4].mxu0 %v1463_v18 }
 0x1aa   :  { %998 = vmatprep.mubr.bf16.mxu0 %v1464_v49 }
 0x1b1   :  { %999 = vmatmul.mubr.bf16.gmra.mrb[8].mxu0 %v1466_v19 }
 0x1b2   :  { %1006 = vmatprep.mubr.bf16.mxu0 %v1467_v3 }
 0x1b9   :  { %1007 = vmatmul.mubr.bf16.gmra.mrb[12].mxu0 %v1469_v39 }
 0x1ba   :  { %1014 = vmatprep.mubr.bf16.mxu0 %v1470_v7 }
 0x1c1   :  { %1015 = vmatmul.mubr.bf16.gmra.mrb[16].mxu0 %v1472_v62 }
 0x1c2   :  { %1022 = vmatprep.mubr.bf16.mxu0 %v1473_v21 }
 0x1c9   :  { %1023 = vmatmul.mubr.bf16.gmra.mrb[20].mxu0 %v1475_v41  ;;  %v833_v41 = vpop.permute.xlu0 %832 }
 0x1ca   :  { %1030 = vmatprep.mubr.bf16.mxu0 %v1476_v17 }
 0x1d1   :  { %1031 = vmatmul.mubr.bf16.gmra.mrb[24].mxu0 %v1478_v9 }
 0x1d2   :  { %1038 = vmatprep.mubr.bf16.mxu0 %v1479_v44 }
 0x1d9   :  { %1039 = vmatmul.mubr.bf16.gmra.mrb[28].mxu0 %v1481_v45  ;;  %v838_v45 = vpop.permute.xlu1 %837 }
 0x274   :  { %v1337_v8 = vpop.f32.mrb[0].mxu0 }
 0x275   :  { %v1338_v46 = vpop.f32.mrb[1].mxu0 }
 0x276   :  { %v1339_v43 = vadd.f32 %v1338_v46, %v1337_v8  ;;  %v1340_v4 = vpop.f32.mrb[2].mxu0 }
 0x277   :  { %v1341_v50 = vpop.f32.mrb[3].mxu0 }
 0x278   :  { %v985_v54 = vadd.f32 %v1339_v43, %v793_v10  ;;  %v1342_v13 = vadd.f32 %v1341_v50, %v1340_v4 }
 0x27a   :  { %v988_v56 = vadd.f32 %v1342_v13, %v798_v55  ;;  %v1047_v60 = vmax.f32 %v985_v54, 0.0  ;;  %v843_v13 = vpop.permute.xlu0 %842 }
 0x27c   :  { %v1048_v22 = vmax.f32 %v988_v56, 0.0  ;;  %v1343_v32 = vpop.f32.mrb[4].mxu0 }
 0x27d   :  { %v1344_v61 = vpop.f32.mrb[5].mxu0 }
 0x27e   :  { %v1345_v52 = vadd.f32 %v1344_v61, %v1343_v32  ;;  %v1346_v63 = vpop.f32.mrb[6].mxu0  ;;  %v1063_v0 = vpack.c.bf16 %v1048_v22, %v1047_v60  ;;  %v848_v22 = vpop.permute.xlu1 %847 }
 0x27f   :  { %v1347_v1 = vpop.f32.mrb[7].mxu0 }
 0x280   :  { %v993_v37 = vadd.f32 %v1345_v52, %v803_v2  ;;  %v1348_v23 = vadd.f32 %v1347_v1, %v1346_v63  ;;  %1397 = vmatprep.subr.bf16.mxu1 %v1063_v0 }
 0x281   :  { %1398 = vmatpush3.bf16.msra.mxu1 %v1063_v0 }
 0x282   :  { %v996_v14 = vadd.f32 %v1348_v23, %v808_v11  ;;  %v1049_v15 = vmax.f32 %v993_v37, 0.0  ;;  %v853_v23 = vpop.permute.xlu0 %852 }
 0x284   :  { %v1050_v28 = vmax.f32 %v996_v14, 0.0  ;;  %v1349_v51 = vpop.f32.mrb[8].mxu0 }
 0x285   :  { %v1350_v6 = vpop.f32.mrb[9].mxu0 }
 0x286   :  { %v1351_v42 = vadd.f32 %v1350_v6, %v1349_v51  ;;  %v1352_v16 = vpop.f32.mrb[10].mxu0  ;;  %v1064_v29 = vpack.c.bf16 %v1050_v28, %v1049_v15  ;;  %v858_v28 = vpop.permute.xlu1 %857 }
 0x287   :  { %v1353_v31 = vpop.f32.mrb[11].mxu0 }
 0x288   :  { %v1001_v26 = vadd.f32 %v1351_v42, %v813_v58  ;;  %v1354_v27 = vadd.f32 %v1353_v31, %v1352_v16  ;;  %1399 = vmatprep.subr.bf16.mxu1 %v1064_v29 }
 0x289   :  { %1400 = vmatpush3.bf16.msra.mxu1 %v1064_v29 }
 0x28a   :  { %v1004_v30 = vadd.f32 %v1354_v27, %v818_v12  ;;  %v1051_v25 = vmax.f32 %v1001_v26, 0.0  ;;  %v863_v27 = vpop.permute.xlu0 %862 }
 0x28c   :  { %v1052_v20 = vmax.f32 %v1004_v30, 0.0  ;;  %v1355_v33 = vpop.f32.mrb[12].mxu0 }
 0x28d   :  { %v1356_v24 = vpop.f32.mrb[13].mxu0 }
 0x28e   :  { %v1357_v36 = vadd.f32 %v1356_v24, %v1355_v33  ;;  %v1358_v57 = vpop.f32.mrb[14].mxu0  ;;  %v1065_v5 = vpack.c.bf16 %v1052_v20, %v1051_v25  ;;  %v868_v20 = vpop.permute.xlu1 %867 }
 0x28f   :  { %v1359_v35 = vpop.f32.mrb[15].mxu0 }
 0x290   :  { %v1009_v48 = vadd.f32 %v1357_v36, %v823_v34  ;;  %v1360_v53 = vadd.f32 %v1359_v35, %v1358_v57  ;;  %1401 = vmatprep.subr.bf16.mxu1 %v1065_v5  ;;  %v1484_v34 = vld [vmem:[%s2201_s5 + $0x10] sm:$0xff]   ;;  %v1485_v35 = vld [vmem:[%s2201_s5 + $0x18] sm:$0xff]  }
 0x291   :  { %1402 = vmatpush3.bf16.msra.mxu1 %v1065_v5  ;;  %v1483_v5 = vld [vmem:[%s2201_s5 + $0x8] sm:$0xff]   ;;  %s1516_s5 = smov [#allocation3]  }
 0x292   :  { %v1012_v18 = vadd.f32 %v1360_v53, %v828_v47  ;;  %v1053_v49 = vmax.f32 %v1009_v48, 0.0  ;;  %v1074_v48 = vpop.permute.xlu0 %1073  ;;  %v1079_v53 = vpop.permute.xlu1 %1078  ;;  %s1292_s29 = sshll.u32 %s1516_s5, 4  ;;  %s1293_s29 = int_to_ptr.vmem [resolvable:$true] %s1292_s29 }
 0x293   :  { %s1490_s30 = scalar_lea.vmem %s1293_s29, 16  ;;  %s1494_s1 = scalar_lea.vmem %s1293_s29, 32 }
 0x294   :  { %v1054_v19 = vmax.f32 %v1012_v18, 0.0  ;;  %v1361_v3 = vpop.f32.mrb[16].mxu0  ;;  %p1491_p0 = scmp.ne.s32.totalorder %s1293_s29, %s1490_s30  ;;  %p1495_p1 = scmp.lt.s32.totalorder %s1293_s29, %s1293_s29 }
 0x295   :  { %v1362_v39 = vpop.f32.mrb[17].mxu0  ;;  %p1496_p2 = scmp.lt.s32.totalorder %s1494_s1, %s1490_s30 }
 0x296   :  { %v1363_v7 = vadd.f32 %v1362_v39, %v1361_v3  ;;  %v1364_v62 = vpop.f32.mrb[18].mxu0  ;;  %v1066_v21 = vpack.c.bf16 %v1054_v19, %v1053_v49  ;;  %v1084_v47 = vpop.permute.xlu0 %1083 }
 0x297   :  { %v1365_v17 = vpop.f32.mrb[19].mxu0  ;;  %v1089_v18 = vpop.permute.xlu1 %1088  ;;  %p1497_p3 = por %p1496_p2, %p1495_p1 }
 0x298   :  { %v1017_v9 = vadd.f32 %v1363_v7, %v833_v41  ;;  %v1366_v44 = vadd.f32 %v1365_v17, %v1364_v62  ;;  %1403 = vmatprep.subr.bf16.mxu1 %v1066_v21 }
 0x299   :  { %1404 = vmatpush3.bf16.msra.mxu1 %v1066_v21  ;;  %p1498_p4 = pnand %p1497_p3, %p1491_p0 }
 0x29a   :  { %v1020_v59 = vadd.f32 %v1366_v44, %v838_v45  ;;  %v1055_v8 = vmax.f32 %v1017_v9, 0.0  ;;  %v1211_v49 = vpop.permute.xlu0 %1210 }
 0x29b   :  { %v1216_v19 = vpop.permute.xlu1 %1215 }
 0x29c   :  { %v1056_v46 = vmax.f32 %v1020_v59, 0.0  ;;  %v1367_v43 = vpop.f32.mrb[20].mxu0 }
 0x29d   :  { %v1368_v4 = vpop.f32.mrb[21].mxu0 }
 0x29e   :  { %v1369_v10 = vadd.f32 %v1368_v4, %v1367_v43  ;;  %v1370_v50 = vpop.f32.mrb[22].mxu0  ;;  %v1067_v54 = vpack.c.bf16 %v1056_v46, %v1055_v8  ;;  %v1094_v3 = vpop.permute.xlu0 %1093 }
 0x29f   :  { %v1371_v55 = vpop.f32.mrb[23].mxu0  ;;  %v1221_v39 = vpop.permute.xlu1 %1220 }
 0x2a0   :  { %v1025_v56 = vadd.f32 %v1369_v10, %v843_v13  ;;  %v1372_v60 = vadd.f32 %v1371_v55, %v1370_v50  ;;  %1405 = vmatprep.subr.bf16.mxu1 %v1067_v54 }
 0x2a1   :  { %1406 = vmatpush3.bf16.msra.mxu1 %v1067_v54 }
 0x2a2   :  { %v1028_v32 = vadd.f32 %v1372_v60, %v848_v22  ;;  %v1057_v61 = vmax.f32 %v1025_v56, 0.0  ;;  %v1099_v7 = vpop.permute.xlu0 %1098 }
 0x2a3   :  { %v1226_v21 = vpop.permute.xlu1 %1225 }
 0x2a4   :  { %v1058_v52 = vmax.f32 %v1028_v32, 0.0  ;;  %v1373_v63 = vpop.f32.mrb[24].mxu0 }
 0x2a5   :  { %v1374_v0 = vpop.f32.mrb[25].mxu0 }
 0x2a6   :  { %v1375_v2 = vadd.f32 %v1374_v0, %v1373_v63  ;;  %v1376_v1 = vpop.f32.mrb[26].mxu0  ;;  %v1068_v37 = vpack.c.bf16 %v1058_v52, %v1057_v61  ;;  %v1104_v43 = vpop.permute.xlu0 %1103 }
 0x2a7   :  { %v1377_v11 = vpop.f32.mrb[27].mxu0  ;;  %v1231_v50 = vpop.permute.xlu1 %1230 }
 0x2a8   :  { %v1033_v14 = vadd.f32 %v1375_v2, %v853_v23  ;;  %v1378_v15 = vadd.f32 %v1377_v11, %v1376_v1  ;;  %1407 = vmatprep.subr.bf16.mxu1 %v1068_v37 }
 0x2a9   :  { %1408 = vmatpush3.bf16.msra.mxu1 %v1068_v37 }
 0x2aa   :  { %v1036_v51 = vadd.f32 %v1378_v15, %v858_v28  ;;  %v1059_v6 = vmax.f32 %v1033_v14, 0.0  ;;  %v1109_v0 = vpop.permute.xlu0 %1108 }
 0x2ab   :  { %v1236_v15 = vpop.permute.xlu1 %1235 }
 0x2ac   :  { %v1060_v42 = vmax.f32 %v1036_v51, 0.0  ;;  %v1379_v16 = vpop.f32.mrb[28].mxu0 }
 0x2ad   :  { %v1380_v29 = vpop.f32.mrb[29].mxu0 }
 0x2ae   :  { %v1381_v58 = vadd.f32 %v1380_v29, %v1379_v16  ;;  %v1382_v31 = vpop.f32.mrb[30].mxu0  ;;  %v1069_v26 = vpack.c.bf16 %v1060_v42, %v1059_v6 }
 0x2af   :  { %v1383_v12 = vpop.f32.mrb[31].mxu0 }
 0x2b0   :  { %v1041_v30 = vadd.f32 %v1381_v58, %v863_v27  ;;  %v1384_v25 = vadd.f32 %v1383_v12, %v1382_v31  ;;  %1409 = vmatprep.subr.bf16.mxu1 %v1069_v26  ;;  %v1241_v31 = vpop.permute.xlu0 %1240  ;;  %v1246_v12 = vpop.permute.xlu1 %1245 }
 0x2b1   :  { %1410 = vmatpush3.bf16.msra.mxu1 %v1069_v26 }
 0x2b2   :  { %v1044_v33 = vadd.f32 %v1384_v25, %v868_v20  ;;  %v1061_v24 = vmax.f32 %v1041_v30, 0.0 }
 0x2b4   :  { %v1062_v36 = vmax.f32 %v1044_v33, 0.0 }
 0x2b6   :  { %v1070_v57 = vpack.c.bf16 %v1062_v36, %v1061_v24 }
 0x2b8   :  { %1411 = vmatprep.subr.bf16.mxu1 %v1070_v57 }
 0x2b9   :  { %1412 = vmatpush3.bf16.msra.mxu1 %v1070_v57 }
 0x2bc   :  { %1414 = vmatmul.mubr.bf16.vlgmr.msra.gmra.mrb[0].mxu1 %v1483_v5  ;;  %v1272_v5 = vpop.permute.xlu0 %1271 }
 0x2bd   :  { %1417 = vmatprep.mubr.bf16.mxu1 %v1484_v34 }
 0x2c4   :  { %1418 = vmatmul.mubr.bf16.gmra.mrb[4].mxu1 %v1485_v35  ;;  %v1277_v35 = vrot.slane %v1272_v5, %v320_v40 }
 0x38f   :  { %v1415_v62 = vpop.f32.mrb[0].mxu1 }
 0x390   :  { %v1169_v41 = vpop.f32.mrb[1].mxu1  ;;  %v1178_v17 = vadd.f32 %v1415_v62, %v1084_v47 }
 0x391   :  { %v1170_v9 = vadd.f32 %v1169_v41, %v1074_v48  ;;  %v1416_v44 = vpop.f32.mrb[2].mxu1 }
 0x392   :  { %v1181_v45 = vadd.f32 %v1416_v44, %v1089_v18  ;;  %v1172_v59 = vpop.f32.mrb[3].mxu1  ;;  %v1202_v4 = vmax.f32 %v1178_v17, 0.0 }
 0x393   :  { %v1200_v8 = vmax.f32 %v1170_v9, 0.0  ;;  %v1173_v46 = vadd.f32 %v1172_v59, %v1079_v53 }
 0x394   :  { %v1203_v54 = vmax.f32 %v1181_v45, 0.0  ;;  %v1250_v22 = vmul.f32 %v1221_v39, %v1202_v4 }
 0x395   :  { %v1201_v10 = vmax.f32 %v1173_v46, 0.0  ;;  %v1248_v13 = vmul.f32 %v1211_v49, %v1200_v8 }
 0x396   :  { %v1251_v2 = vmul.f32 %v1226_v21, %v1203_v54 }
 0x397   :  { %v1249_v55 = vmul.f32 %v1216_v19, %v1201_v10  ;;  %v1419_v56 = vpop.f32.mrb[4].mxu1 }
 0x398   :  { %v1185_v60 = vpop.f32.mrb[5].mxu1  ;;  %v1194_v61 = vadd.f32 %v1419_v56, %v1104_v43 }
 0x399   :  { %v1256_v32 = vadd.f32 %v1249_v55, %v1248_v13  ;;  %v1186_v52 = vadd.f32 %v1185_v60, %v1094_v3  ;;  %v1420_v63 = vpop.f32.mrb[6].mxu1 }
 0x39a   :  { %v1188_v1 = vpop.f32.mrb[7].mxu1  ;;  %v1197_v11 = vadd.f32 %v1420_v63, %v1109_v0  ;;  %v1206_v28 = vmax.f32 %v1194_v61, 0.0 }
 0x39b   :  { %v1257_v37 = vadd.f32 %v1256_v32, %v1250_v22  ;;  %v1204_v23 = vmax.f32 %v1186_v52, 0.0  ;;  %v1189_v14 = vadd.f32 %v1188_v1, %v1099_v7 }
 0x39c   :  { %v1207_v29 = vmax.f32 %v1197_v11, 0.0  ;;  %v1254_v26 = vmul.f32 %v1241_v31, %v1206_v28 }
 0x39d   :  { %v1252_v51 = vmul.f32 %v1231_v50, %v1204_v23  ;;  %v1258_v6 = vadd.f32 %v1257_v37, %v1251_v2  ;;  %v1205_v42 = vmax.f32 %v1189_v14, 0.0 }
 0x39e   :  { %v1255_v30 = vmul.f32 %v1246_v12, %v1207_v29 }
 0x39f   :  { %v1259_v16 = vadd.f32 %v1258_v6, %v1252_v51  ;;  %v1253_v58 = vmul.f32 %v1236_v15, %v1205_v42 }
 0x3a1   :  { %v1260_v27 = vadd.f32 %v1259_v16, %v1253_v58 }
 0x3a3   :  { %v1261_v25 = vadd.f32 %v1260_v27, %v1254_v26 }
 0x3a5   :  { %v1262_v20 = vadd.f32 %v1261_v25, %v1255_v30 }
 0x3a7   :  { %v1263_v33 = vrot.slane %v1262_v20, 4 }
 0x3a9   :  { %v1264_v24 = vadd.f32 %v1263_v33, %v1262_v20 }
 0x3ab   :  { %v1265_v36 = vrot.slane %v1264_v24, 2 }
 0x3ad   :  { %v1266_v57 = vadd.f32 %v1265_v36, %v1264_v24 }
 0x3af   :  { %v1267_v34 = vrot.slane %v1266_v57, 1 }
 0x3b1   :  { %v1268_v48 = vadd.f32 %v1267_v34, %v1266_v57 }
 0x3b3   :  { %v1278_v53 = vadd.f32 %v1277_v35, %v1268_v48 }
 0x3b5   :  { %v1320_v47 = vmul.f32 -1.442695, %v1278_v53 }
 0x3b7   :  { %1486 = vpow2.f32 %v1320_v47 }
 0x3c1   :  { %v1487_v18 = vpop.eup %1486 }
 0x3c2   :  { %v1282_v49 = vadd.f32 1.0, %v1487_v18 }
 0x3c4   :  { %1488 = vrcp.f32 %v1282_v49 }
 0x3ce   :  { %v1489_v19 = vpop.eup %1488 }
 0x3cf   :  { %1285 = vst [vmem:[#allocation3] sm:$0x1] %v1489_v19 }
 0x3d0   :  { %1501 = shalt.err (!%p1498_p4)
}
 0x3d1   :  { %s1502_s12 = scalar_lea.hbm %s2205_s9, 16 }
 0x3d2   :  { %p1503_p5 = scmp.ne.s32.totalorder %s2205_s9, %s1502_s12  ;;  %p1506_p6 = scmp.lt.u32.totalorder %s1502_s12, %s2205_s9 }
 0x3d4   :  { %p1508_p7 = pnand %p1506_p6, %p1503_p5 }
 0x3d6   :  { %1511 = shalt.err (!%p1508_p7)
}
 0x3d7   :  { %1295 = dma.vmem_to_hbm [thread:$0]  %s1293_s29, 16, %s2205_s9, [#allocation4]  }
 0x3d8   :  { %1512 = dma.done.wait [#allocation4], 16  }
 0x3d9   :  { %1513 = vsyncadd [#allocation4], 4294967280 }
 0x3da   :  { %1299 = vsyncpa [#allocation4], 1 }

</bundles_post_ra>
